<compile_context>
chip_gen: v5e
topology: v5e:2x2
jax: 0.10.0
libtpu: 0.0.40
codegen_flags: <defaults>
</compile_context>

<pallas_src>
import jax
import jax.numpy as jnp
from jax.experimental import pallas as pl
from jax.experimental.pallas import tpu as pltpu

_EPS = 1e-8  # nn.CosineSimilarity default eps


def _semi_loss_kernel(sup_a_ref, unsup_a_ref, sup_b_ref, unsup_b_ref, out_ref):
    n = sup_a_ref.shape[0]

    def cosine_sim_col(s_ref, u_ref):
        # Load + cast per operand at point of use (keeps vreg pressure low).
        s = s_ref[...].astype(jnp.float32)
        u = u_ref[...].astype(jnp.float32)
        # PyTorch: w12 / sqrt(clamp_min(w1 * w2, eps^2)), reduced over dim=1.
        dot = jnp.sum(s * u, axis=1, keepdims=True)                    # (N, 1)
        ns2 = jnp.sum(s * s, axis=1, keepdims=True)                    # (N, 1)
        nu2 = jnp.sum(u * u, axis=1, keepdims=True)                    # (N, 1)
        inv = jax.lax.rsqrt(jnp.maximum(ns2 * nu2, _EPS * _EPS))       # EUP
        return dot * inv                                               # (N, 1)

    a_sim = cosine_sim_col(sup_a_ref, unsup_a_ref)   # (N, 1)
    b_sim = cosine_sim_col(sup_b_ref, unsup_b_ref)   # (N, 1)

    # A stream: only the log-softmax (KLDiv input) is needed.
    m_a = jnp.max(a_sim, axis=0, keepdims=True)
    z_a = a_sim - m_a
    log_a = z_a - jnp.log(jnp.sum(jnp.exp(z_a)))     # (N, 1)

    # B stream: reuse exp(z_b) for both log-softmax and the KL target weights;
    # fold the softmax normalization into the final scalar divide.
    m_b = jnp.max(b_sim, axis=0, keepdims=True)
    z_b = b_sim - m_b
    e_b = jnp.exp(z_b)                               # (N, 1) unnormalized probs
    denom_b = jnp.sum(e_b)                           # scalar
    log_b = z_b - jnp.log(denom_b)                   # (N, 1)

    # KLDivLoss(reduction='batchmean') with input=log(A_dist), target=B_dist:
    #   sum(B_dist * (log(B_dist) - log(A_dist))) / N
    #   = sum(e_b * (log_b - log_a)) / (denom_b * N)
    kl = jnp.sum(e_b * (log_b - log_a)) / (denom_b * n)
    out_ref[0, 0] = 1000.0 * kl


def semi_loss(sup_a, unsup_a, sup_b, unsup_b):
    return pl.pallas_call(
        _semi_loss_kernel,
        out_shape=jax.ShapeDtypeStruct((1, 1), jnp.float32),
        in_specs=[
            pl.BlockSpec(memory_space=pltpu.MemorySpace.VMEM) for _ in range(4)
        ],
        out_specs=pl.BlockSpec(memory_space=pltpu.MemorySpace.SMEM),
    )(sup_a, unsup_a, sup_b, unsup_b)[0, 0]


def _semi_loss_ref(sup_a, unsup_a, sup_b, unsup_b):
    # Pure-JAX reference (mirrors PyTorch F.cosine_similarity clamp semantics).
    def cos(x, y):
        w12 = jnp.sum(x * y, axis=1)
        w1 = jnp.sum(x * x, axis=1)
        w2 = jnp.sum(y * y, axis=1)
        return w12 / jnp.sqrt(jnp.maximum(w1 * w2, _EPS * _EPS))

    a_dist = jax.nn.softmax(cos(sup_a, unsup_a), axis=0)
    b_dist = jax.nn.softmax(cos(sup_b, unsup_b), axis=0)
    n = sup_a.shape[0]
    return 1000.0 * jnp.sum(b_dist * (jnp.log(b_dist) - jnp.log(a_dist))) / n


if __name__ == "__main__":
    # SemiLoss has no learnable parameters; only inputs are needed.
    key = jax.random.PRNGKey(0)
    k1, k2, k3, k4 = jax.random.split(key, 4)
    N, D = 8, 128
    sup_a = jax.random.normal(k1, (N, D), dtype=jnp.float32)
    unsup_a = jax.random.normal(k2, (N, D), dtype=jnp.float32)
    sup_b = jax.random.normal(k3, (N, D), dtype=jnp.float32)
    unsup_b = jax.random.normal(k4, (N, D), dtype=jnp.float32)

    loss = semi_loss(sup_a, unsup_a, sup_b, unsup_b)
    jax.block_until_ready(loss)

    ref = _semi_loss_ref(sup_a, unsup_a, sup_b, unsup_b)
    assert jnp.allclose(loss, ref, rtol=1e-4, atol=1e-4), (loss, ref)

    print("KERNEL_OK")
</pallas_src>

<mosaic_0001>
module attributes {stable_mosaic.version = 11 : i64} {
  func.func @_semi_loss_kernel(%arg0: memref<8x128xf32, #tpu.memory_space<vmem>>, %arg1: memref<8x128xf32, #tpu.memory_space<vmem>>, %arg2: memref<8x128xf32, #tpu.memory_space<vmem>>, %arg3: memref<8x128xf32, #tpu.memory_space<vmem>>, %arg4: memref<1x1xf32, #tpu.memory_space<smem>>) attributes {dimension_semantics = [], scalar_prefetch = 0 : i64, scratch_operands = 0 : i64, tpu.core_type = #tpu.core_type<tc>} {
    %c0 = arith.constant 0 : index
    %c0_0 = arith.constant 0 : index
    %0 = vector.load %arg0[%c0, %c0_0] : memref<8x128xf32, #tpu.memory_space<vmem>>, vector<8x128xf32>
    %c0_1 = arith.constant 0 : index
    %c0_2 = arith.constant 0 : index
    %1 = vector.load %arg1[%c0_1, %c0_2] : memref<8x128xf32, #tpu.memory_space<vmem>>, vector<8x128xf32>
    %2 = arith.mulf %0, %1 : vector<8x128xf32>
    %cst = arith.constant dense<0.000000e+00> : vector<8xf32>
    %3 = vector.multi_reduction <add>, %2, %cst [1] : vector<8x128xf32> to vector<8xf32>
    %4 = vector.shape_cast %3 : vector<8xf32> to vector<8x1xf32>
    %5 = arith.mulf %0, %0 : vector<8x128xf32>
    %cst_3 = arith.constant dense<0.000000e+00> : vector<8xf32>
    %6 = vector.multi_reduction <add>, %5, %cst_3 [1] : vector<8x128xf32> to vector<8xf32>
    %7 = vector.shape_cast %6 : vector<8xf32> to vector<8x1xf32>
    %8 = arith.mulf %1, %1 : vector<8x128xf32>
    %cst_4 = arith.constant dense<0.000000e+00> : vector<8xf32>
    %9 = vector.multi_reduction <add>, %8, %cst_4 [1] : vector<8x128xf32> to vector<8xf32>
    %10 = vector.shape_cast %9 : vector<8xf32> to vector<8x1xf32>
    %11 = arith.mulf %7, %10 : vector<8x1xf32>
    %cst_5 = arith.constant 1.000000e-16 : f32
    %12 = vector.broadcast %cst_5 : f32 to vector<8x1xf32>
    %13 = arith.maximumf %11, %12 : vector<8x1xf32>
    %14 = math.rsqrt %13 : vector<8x1xf32>
    %15 = arith.mulf %4, %14 : vector<8x1xf32>
    %c0_6 = arith.constant 0 : index
    %c0_7 = arith.constant 0 : index
    %16 = vector.load %arg2[%c0_6, %c0_7] : memref<8x128xf32, #tpu.memory_space<vmem>>, vector<8x128xf32>
    %c0_8 = arith.constant 0 : index
    %c0_9 = arith.constant 0 : index
    %17 = vector.load %arg3[%c0_8, %c0_9] : memref<8x128xf32, #tpu.memory_space<vmem>>, vector<8x128xf32>
    %18 = arith.mulf %16, %17 : vector<8x128xf32>
    %cst_10 = arith.constant dense<0.000000e+00> : vector<8xf32>
    %19 = vector.multi_reduction <add>, %18, %cst_10 [1] : vector<8x128xf32> to vector<8xf32>
    %20 = vector.shape_cast %19 : vector<8xf32> to vector<8x1xf32>
    %21 = arith.mulf %16, %16 : vector<8x128xf32>
    %cst_11 = arith.constant dense<0.000000e+00> : vector<8xf32>
    %22 = vector.multi_reduction <add>, %21, %cst_11 [1] : vector<8x128xf32> to vector<8xf32>
    %23 = vector.shape_cast %22 : vector<8xf32> to vector<8x1xf32>
    %24 = arith.mulf %17, %17 : vector<8x128xf32>
    %cst_12 = arith.constant dense<0.000000e+00> : vector<8xf32>
    %25 = vector.multi_reduction <add>, %24, %cst_12 [1] : vector<8x128xf32> to vector<8xf32>
    %26 = vector.shape_cast %25 : vector<8xf32> to vector<8x1xf32>
    %27 = arith.mulf %23, %26 : vector<8x1xf32>
    %cst_13 = arith.constant 1.000000e-16 : f32
    %28 = vector.broadcast %cst_13 : f32 to vector<8x1xf32>
    %29 = arith.maximumf %27, %28 : vector<8x1xf32>
    %30 = math.rsqrt %29 : vector<8x1xf32>
    %31 = arith.mulf %20, %30 : vector<8x1xf32>
    %cst_14 = arith.constant dense<0xFF800000> : vector<1xf32>
    %32 = vector.multi_reduction <maximumf>, %15, %cst_14 [0] : vector<8x1xf32> to vector<1xf32>
    %33 = vector.shape_cast %32 : vector<1xf32> to vector<1x1xf32>
    %34 = vector.broadcast %33 : vector<1x1xf32> to vector<8x1xf32>
    %35 = arith.subf %15, %34 : vector<8x1xf32>
    %36 = math.exp %35 : vector<8x1xf32>
    %37 = vector.shape_cast %36 : vector<8x1xf32> to vector<1x8x1xf32>
    %cst_15 = arith.constant dense<0.000000e+00> : vector<1xf32>
    %38 = vector.multi_reduction <add>, %37, %cst_15 [1, 2] : vector<1x8x1xf32> to vector<1xf32>
    %39 = vector.shape_cast %38 : vector<1xf32> to vector<1x1x1xf32>
    %40 = vector.extract %39[0, 0, 0] : f32 from vector<1x1x1xf32>
    %41 = math.log %40 : f32
    %42 = vector.broadcast %41 : f32 to vector<8x1xf32>
    %43 = arith.subf %35, %42 : vector<8x1xf32>
    %cst_16 = arith.constant dense<0xFF800000> : vector<1xf32>
    %44 = vector.multi_reduction <maximumf>, %31, %cst_16 [0] : vector<8x1xf32> to vector<1xf32>
    %45 = vector.shape_cast %44 : vector<1xf32> to vector<1x1xf32>
    %46 = vector.broadcast %45 : vector<1x1xf32> to vector<8x1xf32>
    %47 = arith.subf %31, %46 : vector<8x1xf32>
    %48 = math.exp %47 : vector<8x1xf32>
    %49 = vector.shape_cast %48 : vector<8x1xf32> to vector<1x8x1xf32>
    %cst_17 = arith.constant dense<0.000000e+00> : vector<1xf32>
    %50 = vector.multi_reduction <add>, %49, %cst_17 [1, 2] : vector<1x8x1xf32> to vector<1xf32>
    %51 = vector.shape_cast %50 : vector<1xf32> to vector<1x1x1xf32>
    %52 = vector.extract %51[0, 0, 0] : f32 from vector<1x1x1xf32>
    %53 = math.log %52 : f32
    %54 = vector.broadcast %53 : f32 to vector<8x1xf32>
    %55 = arith.subf %47, %54 : vector<8x1xf32>
    %56 = arith.subf %55, %43 : vector<8x1xf32>
    %57 = arith.mulf %48, %56 : vector<8x1xf32>
    %58 = vector.shape_cast %57 : vector<8x1xf32> to vector<1x8x1xf32>
    %cst_18 = arith.constant dense<0.000000e+00> : vector<1xf32>
    %59 = vector.multi_reduction <add>, %58, %cst_18 [1, 2] : vector<1x8x1xf32> to vector<1xf32>
    %60 = vector.shape_cast %59 : vector<1xf32> to vector<1x1x1xf32>
    %61 = vector.extract %60[0, 0, 0] : f32 from vector<1x1x1xf32>
    %cst_19 = arith.constant 8.000000e+00 : f32
    %62 = arith.mulf %52, %cst_19 : f32
    %63 = arith.divf %61, %62 : f32
    %cst_20 = arith.constant 1.000000e+03 : f32
    %64 = arith.mulf %cst_20, %63 : f32
    %c0_21 = arith.constant 0 : index
    %c0_22 = arith.constant 0 : index
    %65 = memref.load %arg4[%c0_21, %c0_22] : memref<1x1xf32, #tpu.memory_space<smem>>
    memref.store %64, %arg4[%c0_21, %c0_22] : memref<1x1xf32, #tpu.memory_space<smem>>
    return
  }
}

</mosaic_0001>

<bundles_post_ra>
// kernel: tpu_custom_call.1
= control target key start
LH: loop header
LB: loop body
LE: loop exit
PB: predicated region body
PF: predicated region fallthrough
CT: control target
= control target key end

     0   :  { %9 = vsyncpa [#allocation3], 0  ;;  %s418_s0 = inlined_call_operand.hbm [shape: f32[8,128], index: 0, kind: input, shape index: {}]   ;;  %s419_s1 = inlined_call_operand.hbm [shape: f32[8,128], index: 1, kind: input, shape index: {}]   ;;  %s420_s2 = inlined_call_operand.hbm [shape: f32[8,128], index: 2, kind: input, shape index: {}]   ;;  %s421_s3 = inlined_call_operand.hbm [shape: f32[8,128], index: 3, kind: input, shape index: {}]   ;;  %s422_s4 = inlined_call_operand.hbm [shape: f32[1,1], index: 4, kind: output, shape index: {}]  }
   0x1   :  { %10 = vsyncpa [#allocation6], 0 }
   0x2   :  { %11 = vsyncpa [#allocation9], 0  ;;  %s29_s17 = sshll.u32 %s419_s1, 4  ;;  %s30_s17 = int_to_ptr.hbm [resolvable:$true] %s29_s17 }
   0x3   :  { %12 = vsyncpa [#allocation4], 0  ;;  %s370_s18 = smov [#allocation5]   ;;  %s18_s22 = sshll.u32 %s418_s0, 4  ;;  %s19_s22 = int_to_ptr.hbm [resolvable:$true] %s18_s22 }
   0x4   :  { %s31_s19 = sshll.u32 %s370_s18, 4  ;;  %s371_s23 = smov [#allocation2]   ;;  %s32_s19 = int_to_ptr.vmem [resolvable:$true] %s31_s19 }
   0x5   :  { %34 = dma.hbm_to_vmem [thread:$0]  %s30_s17, 128, %s32_s19, [#allocation6]  }
   0x6   :  { %s20_s24 = sshll.u32 %s371_s23, 4  ;;  %s40_s27 = sshll.u32 %s420_s2, 4  ;;  %s21_s24 = int_to_ptr.vmem [resolvable:$true] %s20_s24  ;;  %s41_s27 = int_to_ptr.hbm [resolvable:$true] %s40_s27 }
   0x7   :  { %23 = dma.hbm_to_vmem [thread:$0]  %s19_s22, 128, %s21_s24, [#allocation3]  }
   0x8   :  { %s51_s29 = sshll.u32 %s421_s3, 4  ;;  %s372_s30 = smov [#allocation7]   ;;  %s52_s29 = int_to_ptr.hbm [resolvable:$true] %s51_s29 }
   0x9   :  { %s42_s5 = sshll.u32 %s372_s30, 4  ;;  %s373_s0 = smov [#allocation8]   ;;  %s43_s5 = int_to_ptr.vmem [resolvable:$true] %s42_s5 }
   0xa   :  { %45 = dma.hbm_to_vmem [thread:$0]  %s41_s27, 128, %s43_s5, [#allocation6]  }
   0xb   :  { %s53_s6 = sshll.u32 %s373_s0, 4  ;;  %s54_s6 = int_to_ptr.vmem [resolvable:$true] %s53_s6 }
   0xc   :  { %56 = dma.hbm_to_vmem [thread:$0]  %s52_s29, 128, %s54_s6, [#allocation9]  }
   0xd   :  { %362 = dma.done.wait [#allocation3], 128  }
   0xe   :  { %363 = vsyncadd [#allocation3], 4294967168 }
   0xf   :  { %364 = dma.done.wait [#allocation6], 256  }
  0x10   :  { %365 = vsyncadd [#allocation6], 4294967040 }
  0x11   :  { %366 = dma.done.wait [#allocation9], 128  }
  0x12   :  { %367 = vsyncadd [#allocation9], 4294967168  ;;  %v73_v0 = vld [vmem:[#allocation2] sm:$0xff]  ;;  %v74_v1 = vld [vmem:[#allocation5] sm:$0xff]  ;;  %vm130_vm6 = vcmask 7168   ;;  %s210_s13 = sshll.u32 %s422_s4, 4  ;;  %s211_s13 = int_to_ptr.hbm [resolvable:$true] %s210_s13 }
  0x13   :  { %v98_v2 = vld [vmem:[#allocation8] sm:$0xff]  ;;  %v78_v3 = vmul.f32 %v73_v0, %v73_v0  ;;  %v75_v4 = vmul.f32 %v74_v1, %v73_v0  ;;  %v97_v6 = vld [vmem:[#allocation7] sm:$0xff]  ;;  %v81_v7 = vmul.f32 %v74_v1, %v74_v1  ;;  %s374_s17 = smov [#allocation10]  }
  0x14   :  { %v105_v5 = vmul.f32 %v98_v2, %v98_v2  ;;  %v102_v8 = vmul.f32 %v97_v6, %v97_v6  ;;  %v99_v9 = vmul.f32 %v98_v2, %v97_v6 }
  0x15   :  { %79 = vadd.xlane.f32.xlu0 %v78_v3  ;;  %76 = vadd.xlane.f32.xlu1 %v75_v4 }
  0x16   :  { %106 = vadd.xlane.f32.xlu2 %v105_v5 }
  0x1d   :  { %82 = vadd.xlane.f32.xlu0 %v81_v7  ;;  %103 = vadd.xlane.f32.xlu1 %v102_v8 }
  0x1e   :  { %100 = vadd.xlane.f32.xlu2 %v99_v9 }
  0x88   :  { %v80_v10 = vpop.xlane.xlu0 %79  ;;  %v77_v11 = vpop.xlane.xlu1 %76 }
  0x89   :  { %v107_v12 = vpop.xlane.xlu2 %106 }
  0x90   :  { %v83_v13 = vpop.xlane.xlu0 %82  ;;  %v104_v14 = vpop.xlane.xlu1 %103 }
  0x91   :  { %v84_v15 = vmul.f32 %v83_v13, %v80_v10  ;;  %v108_v16 = vmul.f32 %v107_v12, %v104_v14  ;;  %v101_v30 = vpop.xlane.xlu2 %100 }
  0x93   :  { %v85_v17 = vmax.f32 %v84_v15, 1e-16  ;;  %v109_v18 = vmax.f32 %v108_v16, 1e-16 }
  0x95   :  { %240 = vrsqrt.f32 %v85_v17  ;;  %vm116_vm0 = vweird.f32 %v109_v18  ;;  %vm92_vm3 = vweird.f32 %v85_v17 }
  0x96   :  { %242 = vrsqrt.f32 %v109_v18 }
  0x9b   :  { %v241_v19 = vpop.eup %240 }
  0x9c   :  { %v243_v20 = vpop.eup %242  ;;  %v87_v21 = vmul.f32 %v241_v19, %v85_v17  ;;  %vm93_vm2 = vweird.f32 %v241_v19 }
  0x9d   :  { %v111_v22 = vmul.f32 %v243_v20, %v109_v18  ;;  %vm117_vm1 = vweird.f32 %v243_v20  ;;  %vm94_vm5 = vmor %vm92_vm3, %vm93_vm2 }
  0x9e   :  { %v88_v23 = vmul.f32 %v241_v19, %v87_v21  ;;  %vm118_vm4 = vmor %vm116_vm0, %vm117_vm1 }
  0x9f   :  { %v112_v24 = vmul.f32 %v243_v20, %v111_v22 }
  0xa0   :  { %v89_v25 = vmul.f32 0.5, %v88_v23 }
  0xa1   :  { %v113_v26 = vmul.f32 0.5, %v112_v24 }
  0xa2   :  { %v90_v27 = vsub.f32 1.5, %v89_v25 }
  0xa3   :  { %v114_v28 = vsub.f32 1.5, %v113_v26 }
  0xa4   :  { %v91_v29 = vmul.f32 %v241_v19, %v90_v27 }
  0xa5   :  { %v115_v31 = vmul.f32 %v243_v20, %v114_v28 }
  0xa6   :  { %v95_v32 = vsel %vm94_vm5, %v241_v19, %v91_v29 }
  0xa7   :  { %v96_v33 = vmul.f32 %v95_v32, %v77_v11  ;;  %v119_v34 = vsel %vm118_vm4, %v243_v20, %v115_v31 }
  0xa8   :  { %v120_v35 = vmul.f32 %v119_v34, %v101_v30 }
  0xa9   :  { %v121_v36 = vrot.slane %v96_v33, 4 }
  0xaa   :  { %v147_v37 = vrot.slane %v120_v35, 4 }
  0xab   :  { %v122_v38 = vmax.f32 %v96_v33, %v121_v36 }
  0xac   :  { %v148_v39 = vmax.f32 %v120_v35, %v147_v37 }
  0xad   :  { %v123_v40 = vrot.slane %v122_v38, 2 }
  0xae   :  { %v149_v41 = vrot.slane %v148_v39, 2 }
  0xaf   :  { %v124_v42 = vmax.f32 %v122_v38, %v123_v40 }
  0xb0   :  { %v150_v43 = vmax.f32 %v148_v39, %v149_v41 }
  0xb1   :  { %v125_v44 = vrot.slane %v124_v42, 1 }
  0xb2   :  { %v151_v45 = vrot.slane %v150_v43, 1 }
  0xb3   :  { %v126_v46 = vmax.f32 %v124_v42, %v125_v44 }
  0xb4   :  { %v152_v47 = vmax.f32 %v150_v43, %v151_v45 }
  0xb5   :  { %v127_v48 = vsub.f32 %v96_v33, %v126_v46 }
  0xb6   :  { %v153_v49 = vsub.f32 %v120_v35, %v152_v47 }
  0xb7   :  { %v128_v50 = vmul.f32 1.442695, %v127_v48 }
  0xb8   :  { %v154_v51 = vmul.f32 1.442695, %v153_v49 }
  0xb9   :  { %244 = vpow2.f32 %v128_v50 }
  0xba   :  { %246 = vpow2.f32 %v154_v51 }
  0xbf   :  { %v245_v52 = vpop.eup %244 }
  0xc0   :  { %v247_v53 = vpop.eup %246  ;;  %v131_v54 = vsel %vm130_vm6, %v245_v52, 0.0 }
  0xc1   :  { %132 = vadd.xlane.f32.xlu0 %v131_v54  ;;  %v156_v55 = vsel %vm130_vm6, %v247_v53, 0.0 }
  0xc2   :  { %157 = vadd.xlane.f32.xlu1 %v156_v55 }
 0x134   :  { %v133_v56 = vpop.xlane.xlu0 %132 }
 0x135   :  { %v134_v57 = vrot.slane %v133_v56, 4  ;;  %v158_v63 = vpop.xlane.xlu1 %157 }
 0x136   :  { %v159_v0 = vrot.slane %v158_v63, 4 }
 0x137   :  { %v135_v58 = vadd.f32 %v134_v57, %v133_v56 }
 0x138   :  { %v160_v1 = vadd.f32 %v159_v0, %v158_v63 }
 0x139   :  { %v136_v59 = vrot.slane %v135_v58, 2 }
 0x13a   :  { %v161_v2 = vrot.slane %v160_v1, 2 }
 0x13b   :  { %v137_v60 = vadd.f32 %v136_v59, %v135_v58 }
 0x13c   :  { %v162_v4 = vadd.f32 %v161_v2, %v160_v1 }
 0x13d   :  { %v138_v61 = vrot.slane %v137_v60, 1 }
 0x13e   :  { %v163_v5 = vrot.slane %v162_v4, 1 }
 0x13f   :  { %v139_v62 = vadd.f32 %v138_v61, %v137_v60 }
 0x140   :  { %v164_v8 = vadd.f32 %v163_v5, %v162_v4 }
 0x141   :  { %223 = vpush %v139_v62 }
 0x172   :  { %s224_s2 = spop %223 }
 0x173   :  { %v141_v3 = vstv %s224_s2 }
 0x174   :  { %248 = vlog2.f32 %v141_v3 }
 0x17a   :  { %v249_v6 = vpop.eup %248 }
 0x17b   :  { %v143_v7 = vmul.f32 0.6931472, %v249_v6 }
 0x17d   :  { %225 = vpush %v143_v7 }
 0x17e   :  { %227 = vpush %v164_v8 }
 0x1ae   :  { %s226_s3 = spop %225 }
 0x1af   :  { %s228_s7 = spop %227  ;;  %v145_v12 = vstv %s226_s3 }
 0x1b0   :  { %v166_v9 = vstv %s228_s7  ;;  %v146_v14 = vsub.f32 %v127_v48, %v145_v12  ;;  %s184_s9 = smul.f32 8.0, %s228_s7 }
 0x1b1   :  { %250 = vlog2.f32 %v166_v9 }
 0x1b2   :  { %v185_v19 = vstv %s184_s9 }
 0x1b3   :  { %252 = vrcp.f32 %v185_v19  ;;  %v197_v30 = vand.u32 2147483648, %v185_v19  ;;  %vm191_vm8 = vweird.f32 %v185_v19  ;;  %v195_v31 = vand.u32 2147483647, %v185_v19 }
 0x1b5   :  { %v198_v35 = vor.u32 1.1754944e-38, %v197_v30  ;;  %vm196_vm10 = vcmp.eq.f32.partialorder %v195_v31, 8.507059e+37 }
 0x1b7   :  { %v251_v10 = vpop.eup %250 }
 0x1b8   :  { %v168_v11 = vmul.f32 0.6931472, %v251_v10 }
 0x1b9   :  { %v253_v20 = vpop.eup %252 }
 0x1ba   :  { %229 = vpush %v168_v11  ;;  %v187_v21 = vmul.f32 %v253_v20, %v185_v19  ;;  %vm192_vm7 = vweird.f32 %v253_v20 }
 0x1bb   :  { %vm193_vm9 = vmor %vm191_vm8, %vm192_vm7 }
 0x1bc   :  { %v188_v22 = vsub.f32 1.0, %v187_v21 }
 0x1be   :  { %v189_v25 = vmul.f32 %v253_v20, %v188_v22 }
 0x1c0   :  { %v190_v28 = vadd.f32 %v253_v20, %v189_v25 }
 0x1c2   :  { %v194_v33 = vsel %vm193_vm9, %v253_v20, %v190_v28 }
 0x1c3   :  { %v199_v36 = vsel %vm196_vm10, %v198_v35, %v194_v33 }
 0x1eb   :  { %s230_s8 = spop %229 }
 0x1ec   :  { %v170_v13 = vstv %s230_s8 }
 0x1ed   :  { %v171_v15 = vsub.f32 %v153_v49, %v170_v13 }
 0x1ef   :  { %v172_v16 = vsub.f32 %v171_v15, %v146_v14 }
 0x1f1   :  { %v173_v17 = vmul.f32 %v247_v53, %v172_v16 }
 0x1f3   :  { %v174_v18 = vsel %vm130_vm6, %v173_v17, 0.0 }
 0x1f4   :  { %175 = vadd.xlane.f32.xlu2 %v174_v18 }
 0x267   :  { %v176_v23 = vpop.xlane.xlu2 %175 }
 0x268   :  { %v177_v24 = vrot.slane %v176_v23, 4 }
 0x26a   :  { %v178_v26 = vadd.f32 %v177_v24, %v176_v23 }
 0x26c   :  { %v179_v27 = vrot.slane %v178_v26, 2 }
 0x26e   :  { %v180_v29 = vadd.f32 %v179_v27, %v178_v26 }
 0x270   :  { %v181_v32 = vrot.slane %v180_v29, 1 }
 0x272   :  { %v182_v34 = vadd.f32 %v181_v32, %v180_v29 }
 0x274   :  { %231 = vpush %v182_v34 }
 0x275   :  { %233 = vpush %v199_v36 }
 0x2a5   :  { %s232_s10 = spop %231 }
 0x2a6   :  { %s234_s14 = spop %233 }
 0x2a7   :  { %s201_s15 = smul.f32 %s234_s14, %s232_s10 }
 0x2a9   :  { %s202_s16 = smul.f32 1000.0, %s201_s15 }
 0x2ab   :  { %204 = sst [smem:[#allocation10]] %s202_s16 }
 0x2ac   :  { %213 = dma.smem_to_hbm %s374_s17, 16, %s211_s13, [#allocation4]  }
 0x2ad   :  { %368 = dma.done.wait [#allocation4], 16  }
 0x2ae   :  { %369 = vsyncadd [#allocation4], 4294967280 }
 0x2af   :  { %218 = sfence }
 0x2b0   :  { %219 = vsyncpa [#allocation3], 1 }
 0x2b1   :  { %220 = vsyncpa [#allocation6], 1 }
 0x2b2   :  { %221 = vsyncpa [#allocation9], 1 }
 0x2b3   :  { %222 = vsyncpa [#allocation4], 1 }

</bundles_post_ra>
